<compile_context>
chip_gen: v7x
topology: tpu7x:2x2x1
jax: 0.10.0
libtpu: 0.0.40
codegen_flags: <defaults>
</compile_context>

<pallas_src>
import jax
import jax.numpy as jnp
from jax import lax
from jax.experimental import pallas as pl
from jax.experimental.pallas import tpu as pltpu

DROPOUT_P = 0.1
OUT_FEATURES = 10
OUT_PAD = 128          # lane-dense padded output width


def _round_up(x, m):
    return (x + m - 1) // m * m


def _uniform_bits(shape, row0, seed_u32):
    """Stateless per-element uint32 hash (murmur-style finalizer).

    Portable replacement for pltpu.prng_random_bits; depends on the absolute row
    index so every batch tile (and every core on v7x) draws a distinct dropout mask.
    """
    r = (row0 + lax.broadcasted_iota(jnp.int32, shape, 0)).astype(jnp.uint32)
    c = lax.broadcasted_iota(jnp.int32, shape, 1).astype(jnp.uint32)
    h = (r * jnp.uint32(0x9E3779B1)) ^ (c * jnp.uint32(0x85EBCA77)) ^ seed_u32
    h = h ^ (h >> 16)
    h = h * jnp.uint32(0x7FEB352D)
    h = h ^ (h >> 15)
    h = h * jnp.uint32(0x846CA68B)
    h = h ^ (h >> 16)
    return h


def linresnet_kernel(scalar_ref,                # SMEM (2,) int32: [seed, drop_threshold]
                     x_ref,                     # (TM, F)        bf16
                     w1t_ref, b1_ref,           # (F, F) bf16,   (1, F) f32
                     w2t_ref, b2_ref,           # (F, F) bf16,   (1, F) f32
                     w3t_ref, b3_ref,           # (F, OUT_PAD) bf16 (1/(1-p) folded), (1, OUT_PAD) f32
                     out_ref):                  # (TM, OUT_PAD)  f32
    # h1 = relu(x @ W1^T + b1)   — bf16 operands, f32 accumulation on the MXU
    h1 = jnp.dot(x_ref[...], w1t_ref[...], preferred_element_type=jnp.float32) + b1_ref[...]
    h1 = jnp.maximum(h1, 0.0)

    # h2 = relu(h1 @ W2^T + b2)
    h2 = jnp.dot(h1.astype(jnp.bfloat16), w2t_ref[...],
                 preferred_element_type=jnp.float32) + b2_ref[...]
    h2 = jnp.maximum(h2, 0.0)

    # residual add
    s = h1 + h2

    # Dropout(p): keep iff bits >= p * 2^32 (integer threshold compare;
    # the 1/(1-p) rescale is pre-folded into W3 on the host).
    tm, f = s.shape
    row0 = pl.program_id(0) * tm
    bits = _uniform_bits((tm, f), row0, scalar_ref[0].astype(jnp.uint32))
    keep = bits >= scalar_ref[1].astype(jnp.uint32)
    do = jnp.where(keep, s, 0.0)

    # logits = do @ (W3^T * 1/(1-p)) + b3   (lane-padded to OUT_PAD columns)
    logits = jnp.dot(do.astype(jnp.bfloat16), w3t_ref[...],
                     preferred_element_type=jnp.float32) + b3_ref[...]
    out_ref[...] = logits.astype(out_ref.dtype)


def lin_resnet_forward(x, params, *, seed=0, training=True, block_m=256):
    """x: (B, F) float32.  params: PyTorch-layout dict (W: (out, in), b: (out,))."""
    B, F = x.shape

    # --- batch tiling: TM rows per grid step (multiple of 8 sublanes) ---
    TM = _round_up(min(block_m, _round_up(B, 8)), 8)
    Bp = _round_up(B, TM)
    if Bp != B:
        x = jnp.pad(x, ((0, Bp - B), (0, 0)))
    x = x.astype(jnp.bfloat16)
    grid = (Bp // TM,)

    # --- weight prep (plain-JAX glue): transpose to (in, out), bf16, pad out to 128 lanes ---
    scale = (1.0 / (1.0 - DROPOUT_P)) if training else 1.0
    w1t = params["w1"].T.astype(jnp.bfloat16)
    w2t = params["w2"].T.astype(jnp.bfloat16)
    w3t = jnp.pad(params["w3"].T * scale,
                  ((0, 0), (0, OUT_PAD - OUT_FEATURES))).astype(jnp.bfloat16)
    b1 = params["b1"][None, :].astype(jnp.float32)
    b2 = params["b2"][None, :].astype(jnp.float32)
    b3 = jnp.pad(params["b3"], (0, OUT_PAD - OUT_FEATURES))[None, :].astype(jnp.float32)

    threshold = int(round(DROPOUT_P * 2**32)) if training else 0
    scalars = jnp.array([seed, threshold], dtype=jnp.int32)

    # --- VMEM budget: resident weights + double-buffered x/out tiles + f32 temps ---
    weight_bytes = (2 * F * F + F * OUT_PAD) * 2 + (2 * F + OUT_PAD) * 4
    tile_bytes = 2 * 2 * (TM * F * 2 + TM * OUT_PAD * 4)          # 2x double buffer
    temp_bytes = 6 * TM * max(F, OUT_PAD) * 4
    vmem_limit = int(min(max(weight_bytes + tile_bytes + temp_bytes + (4 << 20), 16 << 20),
                         64 << 20))

    out = pl.pallas_call(
        linresnet_kernel,
        out_shape=jax.ShapeDtypeStruct((Bp, OUT_PAD), jnp.float32),
        grid_spec=pltpu.PrefetchScalarGridSpec(
            num_scalar_prefetch=1,
            grid=grid,
            in_specs=[
                pl.BlockSpec((TM, F), lambda i, s: (i, 0)),          # x tile (pipelined)
                pl.BlockSpec((F, F), lambda i, s: (0, 0)),           # W1^T (resident)
                pl.BlockSpec((1, F), lambda i, s: (0, 0)),
                pl.BlockSpec((F, F), lambda i, s: (0, 0)),           # W2^T (resident)
                pl.BlockSpec((1, F), lambda i, s: (0, 0)),
                pl.BlockSpec((F, OUT_PAD), lambda i, s: (0, 0)),     # W3^T (resident)
                pl.BlockSpec((1, OUT_PAD), lambda i, s: (0, 0)),
            ],
            out_specs=pl.BlockSpec((TM, OUT_PAD), lambda i, s: (i, 0)),
        ),
        compiler_params=pltpu.CompilerParams(
            dimension_semantics=("parallel",),   # shard batch grid across TCs on v7x
            vmem_limit_bytes=vmem_limit,
        ),
    )(scalars, x, w1t, b1, w2t, b2, w3t, b3)

    return out[:B, :OUT_FEATURES]


def init_params(key, nb_features):
    """Deterministic init mimicking nn.Linear shapes: W (out, in), b (out,)."""
    ks = jax.random.split(key, 6)
    bound = 1.0 / jnp.sqrt(nb_features)
    w1 = jax.random.uniform(ks[0], (nb_features, nb_features), jnp.float32, -bound, bound)
    b1 = jax.random.uniform(ks[1], (nb_features,), jnp.float32, -bound, bound)
    w2 = jax.random.uniform(ks[2], (nb_features, nb_features), jnp.float32, -bound, bound)
    b2 = jax.random.uniform(ks[3], (nb_features,), jnp.float32, -bound, bound)
    w3 = jax.random.uniform(ks[4], (10, nb_features), jnp.float32, -bound, bound)
    b3 = jax.random.uniform(ks[5], (10,), jnp.float32, -bound, bound)
    return {"w1": w1, "b1": b1, "w2": w2, "b2": b2, "w3": w3, "b3": b3}


if __name__ == "__main__":
    nb_features = 32
    batch = 8

    key = jax.random.PRNGKey(0)
    kx, kp = jax.random.split(key)
    x = jax.random.normal(kx, (batch, nb_features), dtype=jnp.float32)
    params = init_params(kp, nb_features)

    # Training-mode forward (dropout active, matches module default semantics).
    logits = lin_resnet_forward(x, params, seed=0, training=True)
    jax.block_until_ready(logits)
    assert logits.shape == (batch, 10)
    assert bool(jnp.all(jnp.isfinite(logits)))

    # Eval-mode sanity check against a plain-JAX reference (dropout disabled).
    logits_eval = lin_resnet_forward(x, params, seed=0, training=False)
    jax.block_until_ready(logits_eval)
    h1 = jnp.maximum(x @ params["w1"].T + params["b1"], 0.0)
    h2 = jnp.maximum(h1 @ params["w2"].T + params["b2"], 0.0)
    ref = (h1 + h2) @ params["w3"].T + params["b3"]
    max_err = float(jnp.max(jnp.abs(logits_eval - ref)))
    assert max_err < 0.25, f"eval-mode mismatch vs reference: max_err={max_err}"

    print("KERNEL_OK")
</pallas_src>

<mosaic_0001>
module attributes {stable_mosaic.version = 11 : i64} {
  func.func @linresnet_kernel(%arg0: i32, %arg1: memref<2xi32, #tpu.memory_space<smem>>, %arg2: memref<8x32xbf16, #tpu.memory_space<vmem>>, %arg3: memref<32x32xbf16, #tpu.memory_space<vmem>>, %arg4: memref<1x32xf32, #tpu.memory_space<vmem>>, %arg5: memref<32x32xbf16, #tpu.memory_space<vmem>>, %arg6: memref<1x32xf32, #tpu.memory_space<vmem>>, %arg7: memref<32x128xbf16, #tpu.memory_space<vmem>>, %arg8: memref<1x128xf32, #tpu.memory_space<vmem>>, %arg9: memref<8x128xf32, #tpu.memory_space<vmem>>) attributes {dimension_semantics = [#tpu.dimension_semantics<parallel>], iteration_bounds = array<i64: 1>, scalar_prefetch = 1 : i64, scratch_operands = 0 : i64, tpu.core_type = #tpu.core_type<tc>, window_params = [{transform_indices = @transform_0, window_bounds = array<i64: 8, 32>}, {pipeline_mode = #tpu.pipeline_mode<synchronous>, transform_indices = @transform_1, window_bounds = array<i64: 32, 32>}, {pipeline_mode = #tpu.pipeline_mode<synchronous>, transform_indices = @transform_2, window_bounds = array<i64: 1, 32>}, {pipeline_mode = #tpu.pipeline_mode<synchronous>, transform_indices = @transform_3, window_bounds = array<i64: 32, 32>}, {pipeline_mode = #tpu.pipeline_mode<synchronous>, transform_indices = @transform_4, window_bounds = array<i64: 1, 32>}, {pipeline_mode = #tpu.pipeline_mode<synchronous>, transform_indices = @transform_5, window_bounds = array<i64: 32, 128>}, {pipeline_mode = #tpu.pipeline_mode<synchronous>, transform_indices = @transform_6, window_bounds = array<i64: 1, 128>}, {transform_indices = @transform_7, window_bounds = array<i64: 8, 128>}]} {
    %c0 = arith.constant 0 : index
    %c0_0 = arith.constant 0 : index
    %0 = vector.load %arg2[%c0, %c0_0] : memref<8x32xbf16, #tpu.memory_space<vmem>>, vector<8x32xbf16>
    %c0_1 = arith.constant 0 : index
    %c0_2 = arith.constant 0 : index
    %1 = vector.load %arg3[%c0_1, %c0_2] : memref<32x32xbf16, #tpu.memory_space<vmem>>, vector<32x32xbf16>
    %cst = arith.constant dense<0.000000e+00> : vector<8x32xf32>
    %2 = tpu.matmul %0, %1, %cst {dimension_numbers = #tpu.dot_dimension_numbers<[1], [0], [0], [1], [0, 0, 1, 1], [], []>} : vector<8x32xbf16>, vector<32x32xbf16>, vector<8x32xf32> -> vector<8x32xf32>
    %c0_3 = arith.constant 0 : index
    %c0_4 = arith.constant 0 : index
    %3 = vector.load %arg4[%c0_3, %c0_4] : memref<1x32xf32, #tpu.memory_space<vmem>>, vector<1x32xf32>
    %4 = vector.broadcast %3 : vector<1x32xf32> to vector<8x32xf32>
    %5 = arith.addf %2, %4 : vector<8x32xf32>
    %cst_5 = arith.constant 0.000000e+00 : f32
    %6 = vector.broadcast %cst_5 : f32 to vector<8x32xf32>
    %7 = arith.maximumf %5, %6 : vector<8x32xf32>
    %8 = arith.truncf %7 : vector<8x32xf32> to vector<8x32xbf16>
    %c0_6 = arith.constant 0 : index
    %c0_7 = arith.constant 0 : index
    %9 = vector.load %arg5[%c0_6, %c0_7] : memref<32x32xbf16, #tpu.memory_space<vmem>>, vector<32x32xbf16>
    %cst_8 = arith.constant dense<0.000000e+00> : vector<8x32xf32>
    %10 = tpu.matmul %8, %9, %cst_8 {dimension_numbers = #tpu.dot_dimension_numbers<[1], [0], [0], [1], [0, 0, 1, 1], [], []>} : vector<8x32xbf16>, vector<32x32xbf16>, vector<8x32xf32> -> vector<8x32xf32>
    %c0_9 = arith.constant 0 : index
    %c0_10 = arith.constant 0 : index
    %11 = vector.load %arg6[%c0_9, %c0_10] : memref<1x32xf32, #tpu.memory_space<vmem>>, vector<1x32xf32>
    %12 = vector.broadcast %11 : vector<1x32xf32> to vector<8x32xf32>
    %13 = arith.addf %10, %12 : vector<8x32xf32>
    %cst_11 = arith.constant 0.000000e+00 : f32
    %14 = vector.broadcast %cst_11 : f32 to vector<8x32xf32>
    %15 = arith.maximumf %13, %14 : vector<8x32xf32>
    %16 = arith.addf %7, %15 : vector<8x32xf32>
    %c8_i32 = arith.constant 8 : i32
    %17 = arith.muli %arg0, %c8_i32 : i32
    %c0_12 = arith.constant 0 : index
    %18 = memref.load %arg1[%c0_12] : memref<2xi32, #tpu.memory_space<smem>>
    %19 = tpu.iota {dimensions = array<i32: 0>} : vector<8x32xi32>
    %20 = vector.broadcast %17 : i32 to vector<8x32xi32>
    %21 = arith.addi %20, %19 : vector<8x32xi32>
    %22 = tpu.iota {dimensions = array<i32: 1>} : vector<8x32xi32>
    %c-1640531535_i32 = arith.constant -1640531535 : i32
    %23 = vector.broadcast %c-1640531535_i32 : i32 to vector<8x32xi32>
    %24 = arith.muli %21, %23 : vector<8x32xi32>
    %c-2048144777_i32 = arith.constant -2048144777 : i32
    %25 = vector.broadcast %c-2048144777_i32 : i32 to vector<8x32xi32>
    %26 = arith.muli %22, %25 : vector<8x32xi32>
    %27 = arith.xori %24, %26 : vector<8x32xi32>
    %28 = vector.broadcast %18 : i32 to vector<8x32xi32>
    %29 = arith.xori %27, %28 : vector<8x32xi32>
    %c16_i32 = arith.constant 16 : i32
    %30 = vector.broadcast %c16_i32 : i32 to vector<8x32xi32>
    %31 = arith.shrui %29, %30 : vector<8x32xi32>
    %32 = arith.xori %29, %31 : vector<8x32xi32>
    %c2146121005_i32 = arith.constant 2146121005 : i32
    %33 = vector.broadcast %c2146121005_i32 : i32 to vector<8x32xi32>
    %34 = arith.muli %32, %33 : vector<8x32xi32>
    %c15_i32 = arith.constant 15 : i32
    %35 = vector.broadcast %c15_i32 : i32 to vector<8x32xi32>
    %36 = arith.shrui %34, %35 : vector<8x32xi32>
    %37 = arith.xori %34, %36 : vector<8x32xi32>
    %c-2073254261_i32 = arith.constant -2073254261 : i32
    %38 = vector.broadcast %c-2073254261_i32 : i32 to vector<8x32xi32>
    %39 = arith.muli %37, %38 : vector<8x32xi32>
    %c16_i32_13 = arith.constant 16 : i32
    %40 = vector.broadcast %c16_i32_13 : i32 to vector<8x32xi32>
    %41 = arith.shrui %39, %40 : vector<8x32xi32>
    %42 = arith.xori %39, %41 : vector<8x32xi32>
    %c1 = arith.constant 1 : index
    %43 = memref.load %arg1[%c1] : memref<2xi32, #tpu.memory_space<smem>>
    %44 = vector.broadcast %43 : i32 to vector<8x32xi32>
    %45 = arith.cmpi uge, %42, %44 : vector<8x32xi32>
    %cst_14 = arith.constant 0.000000e+00 : f32
    %46 = vector.broadcast %cst_14 : f32 to vector<8x32xf32>
    %47 = arith.select %45, %16, %46 : vector<8x32xi1>, vector<8x32xf32>
    %48 = arith.truncf %47 : vector<8x32xf32> to vector<8x32xbf16>
    %c0_15 = arith.constant 0 : index
    %c0_16 = arith.constant 0 : index
    %49 = vector.load %arg7[%c0_15, %c0_16] : memref<32x128xbf16, #tpu.memory_space<vmem>>, vector<32x128xbf16>
    %cst_17 = arith.constant dense<0.000000e+00> : vector<8x128xf32>
    %50 = tpu.matmul %48, %49, %cst_17 {dimension_numbers = #tpu.dot_dimension_numbers<[1], [0], [0], [1], [0, 0, 1, 1], [], []>} : vector<8x32xbf16>, vector<32x128xbf16>, vector<8x128xf32> -> vector<8x128xf32>
    %c0_18 = arith.constant 0 : index
    %c0_19 = arith.constant 0 : index
    %51 = vector.load %arg8[%c0_18, %c0_19] : memref<1x128xf32, #tpu.memory_space<vmem>>, vector<1x128xf32>
    %52 = vector.broadcast %51 : vector<1x128xf32> to vector<8x128xf32>
    %53 = arith.addf %50, %52 : vector<8x128xf32>
    %c0_20 = arith.constant 0 : index
    %c0_21 = arith.constant 0 : index
    %54 = vector.load %arg9[%c0_20, %c0_21] : memref<8x128xf32, #tpu.memory_space<vmem>>, vector<8x128xf32>
    tpu.vector_store %arg9[%c0_20, %c0_21], %53 {strides = array<i32>} : memref<8x128xf32, #tpu.memory_space<vmem>>, vector<8x128xf32>,
    return
  }
  func.func @transform_0(%arg0: i32, %arg1: memref<2xi32, #tpu.memory_space<smem>>) -> (i32, i32) {
    %c0_i32 = arith.constant 0 : i32
    %c0_i32_0 = arith.constant 0 : i32
    return %arg0, %c0_i32 : i32, i32
  }
  func.func @transform_1(%arg0: i32, %arg1: memref<2xi32, #tpu.memory_space<smem>>) -> (i32, i32) {
    %c0_i32 = arith.constant 0 : i32
    %c0_i32_0 = arith.constant 0 : i32
    %c0_i32_1 = arith.constant 0 : i32
    return %c0_i32, %c0_i32_0 : i32, i32
  }
  func.func @transform_2(%arg0: i32, %arg1: memref<2xi32, #tpu.memory_space<smem>>) -> (i32, i32) {
    %c0_i32 = arith.constant 0 : i32
    %c0_i32_0 = arith.constant 0 : i32
    %c0_i32_1 = arith.constant 0 : i32
    return %c0_i32, %c0_i32_0 : i32, i32
  }
  func.func @transform_3(%arg0: i32, %arg1: memref<2xi32, #tpu.memory_space<smem>>) -> (i32, i32) {
    %c0_i32 = arith.constant 0 : i32
    %c0_i32_0 = arith.constant 0 : i32
    %c0_i32_1 = arith.constant 0 : i32
    return %c0_i32, %c0_i32_0 : i32, i32
  }
  func.func @transform_4(%arg0: i32, %arg1: memref<2xi32, #tpu.memory_space<smem>>) -> (i32, i32) {
    %c0_i32 = arith.constant 0 : i32
    %c0_i32_0 = arith.constant 0 : i32
    %c0_i32_1 = arith.constant 0 : i32
    return %c0_i32, %c0_i32_0 : i32, i32
  }
  func.func @transform_5(%arg0: i32, %arg1: memref<2xi32, #tpu.memory_space<smem>>) -> (i32, i32) {
    %c0_i32 = arith.constant 0 : i32
    %c0_i32_0 = arith.constant 0 : i32
    %c0_i32_1 = arith.constant 0 : i32
    return %c0_i32, %c0_i32_0 : i32, i32
  }
  func.func @transform_6(%arg0: i32, %arg1: memref<2xi32, #tpu.memory_space<smem>>) -> (i32, i32) {
    %c0_i32 = arith.constant 0 : i32
    %c0_i32_0 = arith.constant 0 : i32
    %c0_i32_1 = arith.constant 0 : i32
    return %c0_i32, %c0_i32_0 : i32, i32
  }
  func.func @transform_7(%arg0: i32, %arg1: memref<2xi32, #tpu.memory_space<smem>>) -> (i32, i32) {
    %c0_i32 = arith.constant 0 : i32
    %c0_i32_0 = arith.constant 0 : i32
    return %arg0, %c0_i32 : i32, i32
  }
}

</mosaic_0001>

<bundles_post_ra>
// kernel: tpu_custom_call.1
= control target key start
LH: loop header
LB: loop body
LE: loop exit
PB: predicated region body
PF: predicated region fallthrough
CT: control target
= control target key end

     0   :  { %s624_s0 = inlined_call_operand.hbm [shape: s32[2], index: 0, kind: input, shape index: {}]   ;;  %s625_s1 = inlined_call_operand.hbm [shape: bf16[8,32], index: 1, kind: input, shape index: {}]   ;;  %s626_s2 = inlined_call_operand.hbm [shape: bf16[32,32], index: 2, kind: input, shape index: {}]   ;;  %s627_s3 = inlined_call_operand.vmem [shape: f32[1,32], index: 3, kind: input, shape index: {}]   ;;  %s628_s4 = inlined_call_operand.hbm [shape: bf16[32,32], index: 4, kind: input, shape index: {}]   ;;  %s629_s5 = inlined_call_operand.vmem [shape: f32[1,32], index: 5, kind: input, shape index: {}]   ;;  %s630_s6 = inlined_call_operand.vmem [shape: bf16[32,128], index: 6, kind: input, shape index: {}]   ;;  %s631_s7 = inlined_call_operand.vmem [shape: f32[1,128], index: 7, kind: input, shape index: {}]   ;;  %s632_s8 = inlined_call_operand.hbm [shape: f32[8,128], index: 8, kind: output, shape index: {}]  }
   0x1   :  { %s380_s29 = scalar_lea.hbm %s624_s0, 16 }
   0x2   :  { %p381_p0 = scmp.ne.s32.totalorder %s624_s0, %s380_s29  ;;  %p384_p1 = scmp.lt.u32.totalorder %s380_s29, %s624_s0 }
   0x4   :  { %p386_p2 = pnand %p384_p1, %p381_p0 }
   0x6   :  { %389 = shalt.err (!%p386_p2)  }
   0x7   :  { %s486_s12 = smov [#allocation3]  }
   0x8   :  { %14 = dma.hbm_to_smem %s624_s0, 16, %s486_s12, [#allocation2] }
   0x9   :  { %478 = dma.done.wait [#allocation2], 16 }
   0xa   :  { %479 = vsyncadd [#allocation2], 4294967280 }
   0xb   :  { %16 = sfence }
   0xc   :  { %17 = vsyncpa [#allocation5], 0 }
   0xd   :  { %18 = vsyncpa [#allocation8], 0 }
   0xe   :  { %19 = vsyncpa [#allocation6], 0  ;;  %s487_s15 = smov [#allocation7]   ;;  %s390_s19 = scalar_lea.hbm %s626_s2, 256 }
   0xf   :  { %s35_s16 = sshll.u32 %s487_s15, 4  ;;  %p391_p3 = scmp.ne.s32.totalorder %s626_s2, %s390_s19  ;;  %s36_s16 = int_to_ptr.vmem [resolvable:$true] %s35_s16 }
  0x10   :  { %p394_p4 = scmp.lt.u32.totalorder %s390_s19, %s626_s2 }
  0x12   :  { %p396_p5 = pnand %p394_p4, %p391_p3 }
  0x14   :  { %399 = shalt.err (!%p396_p5)
}
  0x15   :  { %s400_s0 = scalar_lea.vmem %s36_s16, 256  ;;  %p405_p7 = scmp.lt.s32.totalorder %s36_s16, %s36_s16 }
  0x16   :  { %p401_p6 = scmp.ne.s32.totalorder %s36_s16, %s400_s0  ;;  %p406_p8 = scmp.lt.s32.totalorder %s400_s0, %s400_s0 }
  0x18   :  { %p407_p9 = por %p406_p8, %p405_p7 }
  0x1a   :  { %p408_p10 = pnand %p407_p9, %p401_p6 }
  0x1c   :  { %411 = shalt.err (!%p408_p10)
}
  0x1d   :  { %s488_s24 = smov 64   ;;  %s489_s25 = smov 4  }
  0x1e   :  { %41 = dma.hbm_to_vmem [thread:$0]  %s626_s2, 256, %s36_s16, [#allocation8], %s488_s24, %s488_s24, %s489_s25  }
  0x1f   :  { %s490_s28 = smov [#allocation4]   ;;  %s491_s30 = smov [#allocation9]  }
  0x20   :  { %s26_s29 = sshll.u32 %s490_s28, 4  ;;  %s49_s9 = sshll.u32 %s491_s30, 4  ;;  %s27_s29 = int_to_ptr.vmem [resolvable:$true] %s26_s29  ;;  %s50_s9 = int_to_ptr.vmem [resolvable:$true] %s49_s9 }
  0x21   :  { %s412_s12 = scalar_lea.hbm %s625_s1, 64 }
  0x22   :  { %p413_p11 = scmp.ne.s32.totalorder %s625_s1, %s412_s12  ;;  %p416_p12 = scmp.lt.u32.totalorder %s412_s12, %s625_s1 }
  0x24   :  { %p418_p13 = pnand %p416_p12, %p413_p11 }
  0x26   :  { %421 = shalt.err (!%p418_p13)
}
  0x27   :  { %s422_s2 = scalar_lea.vmem %s27_s29, 64  ;;  %p427_p1 = scmp.lt.s32.totalorder %s27_s29, %s27_s29 }
  0x28   :  { %p423_p0 = scmp.ne.s32.totalorder %s27_s29, %s422_s2  ;;  %p428_p2 = scmp.lt.s32.totalorder %s422_s2, %s422_s2 }
  0x2a   :  { %p429_p3 = por %p428_p2, %p427_p1 }
  0x2c   :  { %p430_p4 = pnand %p429_p3, %p423_p0 }
  0x2e   :  { %433 = shalt.err (!%p430_p4)
}
  0x2f   :  { %29 = dma.hbm_to_vmem [thread:$0]  %s625_s1, 64, %s27_s29, [#allocation5]  }
  0x30   :  { %s434_s21 = scalar_lea.hbm %s628_s4, 256 }
  0x31   :  { %p435_p5 = scmp.ne.s32.totalorder %s628_s4, %s434_s21  ;;  %p438_p6 = scmp.lt.u32.totalorder %s434_s21, %s628_s4 }
  0x33   :  { %p440_p7 = pnand %p438_p6, %p435_p5 }
  0x35   :  { %443 = shalt.err (!%p440_p7)
}
  0x36   :  { %s444_s27 = scalar_lea.vmem %s50_s9, 256  ;;  %p449_p9 = scmp.lt.s32.totalorder %s50_s9, %s50_s9 }
  0x37   :  { %p445_p8 = scmp.ne.s32.totalorder %s50_s9, %s444_s27  ;;  %p450_p10 = scmp.lt.s32.totalorder %s444_s27, %s444_s27 }
  0x39   :  { %p451_p11 = por %p450_p10, %p449_p9 }
  0x3b   :  { %p452_p12 = pnand %p451_p11, %p445_p8 }
  0x3d   :  { %455 = shalt.err (!%p452_p12)
}
  0x3e   :  { %55 = dma.hbm_to_vmem [thread:$0]  %s628_s4, 256, %s50_s9, [#allocation8], %s488_s24, %s488_s24, %s489_s25  }
  0x3f   :  { %480 = dma.done.wait [#allocation5], 64  }
  0x40   :  { %481 = vsyncadd [#allocation5], 4294967232 }
  0x41   :  { %482 = dma.done.wait [#allocation8], 512  }
  0x42   :  { %483 = vsyncadd [#allocation8], 4294966784  ;;  %v492_v0 = vmov 0.0   ;;  %vm493_vm0 = vmmov 0   ;;  %v374_v1 = vld [vmem:[#allocation7] sm:$0xff]   ;;  %v375_v2 = vld [vmem:[#allocation7 + $0x8] sm:$0xff]   ;;  %v212_v16 = vlaneseq }
  0x43   :  { %341 = vmatprep.subr.bf16.mxu0 %v492_v0  ;;  %345 = vmatprep.mubr.msk.bf16.mxu0 %vm493_vm0, %v492_v0  ;;  %v72_v3 = vld [vmem:[#allocation4] sm:$0xf]  ;;  %vm96_vm1 = vcmask 261120   ;;  %v376_v4 = vld [vmem:[#allocation9] sm:$0xff]   ;;  %v319_v6 = vld [vmem:[%s627_s3] ss:$0 sm:$0xff] }
  0x44   :  { %349 = vmatprep.subr.bf16.mxu1 %v492_v0  ;;  %353 = vmatprep.mubr.msk.bf16.mxu1 %vm493_vm0, %v492_v0  ;;  %v377_v5 = vld [vmem:[#allocation9 + $0x8] sm:$0xff]   ;;  %v378_v14 = vld [vmem:[%s630_s6] sm:$0xff]   ;;  %v213_v17 = vshrl.u32 %v212_v16, 7  ;;  %v217_v18 = vand.u32 127, %v212_v16  ;;  %s211_s3 = sld [smem:[#allocation3]]  ;;  %s327_s10 = sld [smem:[#allocation3 + $0x1]] }
  0x45   :  { %342 = vmatpush3.bf16.msra.mxu0 %v374_v1  ;;  %350 = vmatpush3.bf16.msra.mxu1 %v376_v4  ;;  %v379_v15 = vld [vmem:[%s630_s6 + $0x8] sm:$0xff]   ;;  %v323_v31 = vld [vmem:[%s629_s5] ss:$0 sm:$0xff]  ;;  %s494_s14 = smov [#allocation10]  }
  0x46   :  { %343 = vmatprep.subr.bf16.mxu0 %v492_v0  ;;  %351 = vmatprep.subr.bf16.mxu1 %v492_v0  ;;  %v218_v19 = vmul.u32 2654435761, %v213_v17  ;;  %v219_v20 = vmul.u32 2246822519, %v217_v18  ;;  %v328_v43 = vld [vmem:[%s631_s7] ss:$0 sm:$0xff] }
  0x47   :  { %s309_s5 = sshll.u32 %s494_s14, 4  ;;  %s310_s5 = int_to_ptr.vmem [resolvable:$true] %s309_s5 }
  0x48   :  { %v220_v21 = vxor.u32 %v219_v20, %v218_v19  ;;  %s456_s15 = scalar_lea.vmem %s310_s5, 128  ;;  %p461_p0 = scmp.lt.s32.totalorder %s310_s5, %s310_s5 }
  0x49   :  { %344 = vmatpush3.bf16.msra.mxu0 %v375_v2  ;;  %352 = vmatpush3.bf16.msra.mxu1 %v377_v5  ;;  %p457_p13 = scmp.ne.s32.totalorder %s310_s5, %s456_s15  ;;  %p462_p1 = scmp.lt.s32.totalorder %s456_s15, %s456_s15 }
  0x4a   :  { %357 = vmatprep.subr.bf16.mxu0 %v492_v0  ;;  %v221_v22 = vstv %s211_s3  ;;  %v232_v35 = vstv %s327_s10 }
  0x4b   :  { %v222_v23 = vxor.u32 %v221_v22, %v220_v21  ;;  %p463_p2 = por %p462_p1, %p461_p0 }
  0x4c   :  { %346 = vmatmul.mubr.msk.bf16.vlgmr.msra.gmra.mrb[0].mxu0 %vm96_vm1, %v72_v3 }
  0x4d   :  { %361 = vmatprep.mubr.msk.bf16.mxu0 %vm493_vm0, %v492_v0  ;;  %358 = vmatpush3.bf16.msra.mxu0 %v378_v14  ;;  %v223_v24 = vshrl.u32 %v222_v23, 16  ;;  %p464_p3 = pnand %p463_p2, %p457_p13 }
  0x4e   :  { %359 = vmatprep.subr.bf16.mxu0 %v492_v0 }
  0x4f   :  { %v224_v25 = vxor.u32 %v223_v24, %v222_v23 }
  0x51   :  { %360 = vmatpush3.bf16.msra.mxu0 %v379_v15  ;;  %v225_v26 = vmul.u32 2146121005, %v224_v25 }
  0x53   :  { %v226_v27 = vshrl.u32 %v225_v26, 15 }
  0x55   :  { %v227_v28 = vxor.u32 %v226_v27, %v225_v26 }
  0x57   :  { %v228_v29 = vmul.u32 2221713035, %v227_v28 }
  0x59   :  { %v229_v30 = vshrl.u32 %v228_v29, 16 }
  0x5b   :  { %v230_v33 = vxor.u32 %v229_v30, %v228_v29 }
  0x5d   :  { %vm233_vm2 = vcmp.ge.u32.totalorder %v230_v33, %v232_v35 }
 0x11f   :  { %v134_v7 = vpop.f32.mrb[0].mxu0 }
 0x120   :  { %v135_v8 = vadd.f32 %v319_v6, %v134_v7  ;;  %v347_v9 = vpop.f32.mrb[1].mxu0 }
 0x121   :  { %v137_v10 = vpop.f32.mrb[2].mxu0 }
 0x122   :  { %v140_v11 = vmax.f32 %v135_v8, 0.0  ;;  %v348_v12 = vpop.f32.mrb[3].mxu0 }
 0x124   :  { %v141_v13 = vpack.c.bf16 %v140_v11, %v140_v11 }
 0x126   :  { %354 = vmatmul.mubr.msk.bf16.vlgmr.msra.gmra.mrb[0].mxu1 %vm96_vm1, %v141_v13 }
 0x1f9   :  { %v202_v32 = vpop.f32.mrb[0].mxu1 }
 0x1fa   :  { %v203_v34 = vadd.f32 %v323_v31, %v202_v32  ;;  %v355_v36 = vpop.f32.mrb[1].mxu1 }
 0x1fb   :  { %v205_v37 = vpop.f32.mrb[2].mxu1 }
 0x1fc   :  { %v208_v38 = vmax.f32 %v203_v34, 0.0  ;;  %v356_v39 = vpop.f32.mrb[3].mxu1 }
 0x1fe   :  { %v209_v40 = vadd.f32 %v208_v38, %v140_v11 }
 0x200   :  { %v234_v41 = vsel %vm233_vm2, %v209_v40, 0.0 }
 0x201   :  { %v235_v42 = vpack.c.bf16 %v234_v41, %v234_v41 }
 0x203   :  { %362 = vmatmul.mubr.msk.bf16.vlgmr.msra.gmra.mrb[4].mxu0 %vm96_vm1, %v235_v42 }
 0x2d6   :  { %v296_v44 = vpop.f32.mrb[4].mxu0 }
 0x2d7   :  { %v297_v45 = vadd.f32 %v328_v43, %v296_v44  ;;  %v363_v46 = vpop.f32.mrb[5].mxu0 }
 0x2d8   :  { %v299_v47 = vpop.f32.mrb[6].mxu0 }
 0x2d9   :  { %302 = vst [vmem:[#allocation10] sm:$0xff] %v297_v45  ;;  %v364_v48 = vpop.f32.mrb[7].mxu0 }
 0x2da   :  { %467 = shalt.err (!%p464_p3)
}
 0x2db   :  { %s468_s7 = scalar_lea.hbm %s632_s8, 128 }
 0x2dc   :  { %p469_p4 = scmp.ne.s32.totalorder %s632_s8, %s468_s7  ;;  %p472_p5 = scmp.lt.u32.totalorder %s468_s7, %s632_s8 }
 0x2de   :  { %p474_p6 = pnand %p472_p5, %p469_p4 }
 0x2e0   :  { %477 = shalt.err (!%p474_p6)
}
 0x2e1   :  { %312 = dma.vmem_to_hbm [thread:$0]  %s310_s5, 128, %s632_s8, [#allocation6]  }
 0x2e2   :  { %484 = dma.done.wait [#allocation6], 128  }
 0x2e3   :  { %485 = vsyncadd [#allocation6], 4294967168 }
 0x2e4   :  { %316 = vsyncpa [#allocation5], 1 }
 0x2e5   :  { %317 = vsyncpa [#allocation8], 1 }
 0x2e6   :  { %318 = vsyncpa [#allocation6], 1 }

</bundles_post_ra>
